<compile_context>
chip_gen: v5e
topology: v5e:2x2
jax: 0.10.0
libtpu: 0.0.40
codegen_flags: <defaults>
</compile_context>

<pallas_src>
import functools

import jax
import jax.numpy as jnp
from jax.experimental import pallas as pl
from jax.experimental.pallas import tpu as pltpu

_LANE = 128
_SUBLANE = 8


def _round_up(a: int, b: int) -> int:
    return -(-a // b) * b


def _pad_to(a, shape):
    """Zero-pad `a` up to `shape` (no-op if already that shape)."""
    if tuple(a.shape) == tuple(shape):
        return a
    return jnp.zeros(shape, a.dtype).at[tuple(slice(0, s) for s in a.shape)].set(a)


def mlp_kernel(x_ref, w1_ref, b1_ref, w2_ref, b2_ref, o_ref):
    cdt = w1_ref.dtype  # compute dtype for MXU operands (bf16 when prepared)
    # Layer 1: Linear(F_in -> F_in); bf16 operands, f32 accumulation.
    h = jnp.dot(x_ref[...].astype(cdt), w1_ref[...],
                preferred_element_type=jnp.float32)
    # Bias add + Dropout(0.4) in eval mode (identity) + ReLU, all in f32 (VPU).
    h = jnp.maximum(h + b1_ref[...], 0.0)
    # Layer 2: Linear(F_in -> F_out).
    out = jnp.dot(h.astype(w2_ref.dtype), w2_ref[...],
                  preferred_element_type=jnp.float32)
    o_ref[...] = (out + b2_ref[...]).astype(o_ref.dtype)


def prepare_params(w1, b1, w2, b2, *, param_dtype=jnp.bfloat16):
    """One-time (outside jit) feature-axis padding to lane multiples + weight cast.

    w1: (f_in, f_in)  (pre-transposed vs. PyTorch's (out, in))
    b1: (f_in,) or (1, f_in)
    w2: (f_in, f_out)
    b2: (f_out,) or (1, f_out)
    Returns (w1_p, b1_p, w2_p, b2_p, f_out) with feature dims padded to 128 and
    weights cast to `param_dtype`; biases stay f32.
    """
    f_in, f_out = w1.shape[0], w2.shape[1]
    f_in_p = _round_up(max(f_in, _LANE), _LANE)
    f_out_p = _round_up(max(f_out, _LANE), _LANE)
    w1_p = _pad_to(w1.astype(param_dtype), (f_in_p, f_in_p))
    w2_p = _pad_to(w2.astype(param_dtype), (f_in_p, f_out_p))
    b1_p = _pad_to(jnp.reshape(b1, (1, -1)).astype(jnp.float32), (1, f_in_p))
    b2_p = _pad_to(jnp.reshape(b2, (1, -1)).astype(jnp.float32), (1, f_out_p))
    return w1_p, b1_p, w2_p, b2_p, f_out


def mlp_forward_xla(x, w1, b1, w2, b2):
    """Plain-XLA fallback; preferable for tiny shapes (e.g. B * f_in < ~64k)
    where per-grid-step overhead and feature padding dominate."""
    h = jnp.maximum(
        jnp.dot(x.astype(w1.dtype), w1, preferred_element_type=jnp.float32)
        + jnp.reshape(b1, (1, -1)).astype(jnp.float32), 0.0)
    return (jnp.dot(h.astype(w2.dtype), w2, preferred_element_type=jnp.float32)
            + jnp.reshape(b2, (1, -1)).astype(jnp.float32))


@functools.partial(jax.jit, static_argnames=("out_features", "block_b"))
def mlp_forward(x, w1, b1, w2, b2, *, out_features=None, block_b=256):
    """Fused relu(x @ W1 + b1) @ W2 + b2 (dropout in eval mode == identity).

    Prefer passing params from `prepare_params` (already lane-padded, bf16) so
    no per-call padding traffic is emitted. `out_features` is the true output
    width when W2 is pre-padded.
    """
    B, f_in = x.shape
    if out_features is None:
        out_features = int(w2.shape[1])

    # Target lane-dense feature widths (no-ops when params are prepared).
    f_in_p = _round_up(max(f_in, w1.shape[0], _LANE), _LANE)
    f_out_p = _round_up(max(w2.shape[1], _LANE), _LANE)

    # Pad only what actually needs padding (static shape checks).
    x_p = _pad_to(x, (B, f_in_p))                       # lane padding only, no batch pad
    w1_p = _pad_to(w1, (f_in_p, f_in_p))
    w2_p = _pad_to(w2, (f_in_p, f_out_p))
    b1_p = _pad_to(jnp.reshape(b1, (1, -1)).astype(jnp.float32), (1, f_in_p))
    b2_p = _pad_to(jnp.reshape(b2, (1, -1)).astype(jnp.float32), (1, f_out_p))

    # Balanced batch tiles; ragged last tile is masked by Pallas (no batch pad).
    num_tiles = max(pl.cdiv(B, block_b), 2 if B >= 2 * _SUBLANE else 1)
    tb = _round_up(pl.cdiv(B, num_tiles), _SUBLANE)
    if tb >= B:
        tb = B  # single block spanning the full (possibly unaligned) batch
    grid_b = pl.cdiv(B, tb)

    # Explicit VMEM budget: resident weights (single-buffered) + double-buffered
    # x/out tiles + f32 intermediates, with headroom.
    w_item = jnp.dtype(w1_p.dtype).itemsize
    x_item = jnp.dtype(x_p.dtype).itemsize
    resident = (f_in_p * f_in_p + f_in_p * f_out_p) * w_item + (f_in_p + f_out_p) * 4
    streamed = 2 * tb * (f_in_p * x_item + f_out_p * 4)
    scratch = tb * (f_in_p + f_out_p) * 4
    vmem_bytes = int(1.25 * (resident + streamed + scratch)) + (4 << 20)
    vmem_bytes = max(16 << 20, min(vmem_bytes, 128 << 20))

    cost = pl.CostEstimate(
        flops=2 * B * f_in_p * (f_in_p + f_out_p),
        transcendentals=0,
        bytes_accessed=(B * f_in_p * x_item + B * f_out_p * 4
                        + (f_in_p * f_in_p + f_in_p * f_out_p) * w_item
                        + (f_in_p + f_out_p) * 4),
    )

    out_p = pl.pallas_call(
        mlp_kernel,
        out_shape=jax.ShapeDtypeStruct((B, f_out_p), jnp.float32),
        grid_spec=pltpu.PrefetchScalarGridSpec(
            num_scalar_prefetch=0,
            grid=(grid_b,),
            in_specs=[
                # x: one batch tile per grid step (auto double-buffered).
                pl.BlockSpec((tb, f_in_p), lambda i: (i, 0)),
                # Weights / biases: constant block -> resident, single-buffered.
                pl.BlockSpec((f_in_p, f_in_p), lambda i: (0, 0),
                             pipeline_mode=pl.Buffered(1)),
                pl.BlockSpec((1, f_in_p), lambda i: (0, 0),
                             pipeline_mode=pl.Buffered(1)),
                pl.BlockSpec((f_in_p, f_out_p), lambda i: (0, 0),
                             pipeline_mode=pl.Buffered(1)),
                pl.BlockSpec((1, f_out_p), lambda i: (0, 0),
                             pipeline_mode=pl.Buffered(1)),
            ],
            out_specs=pl.BlockSpec((tb, f_out_p), lambda i: (i, 0)),
        ),
        compiler_params=pltpu.CompilerParams(
            dimension_semantics=("parallel",),
            vmem_limit_bytes=vmem_bytes,
        ),
        cost_estimate=cost,
    )(x_p, w1_p, b1_p, w2_p, b2_p)

    if f_out_p != out_features:
        out_p = out_p[:, :out_features]
    return out_p


def init_params(key, input_size, output_size):
    """Deterministic init matching nn.Linear shapes (stored pre-transposed, f32)."""
    k1, k2, k3, k4 = jax.random.split(key, 4)
    bound = 1.0 / (input_size ** 0.5)
    w1 = jax.random.uniform(k1, (input_size, input_size), jnp.float32, -bound, bound)
    b1 = jax.random.uniform(k2, (input_size,), jnp.float32, -bound, bound)
    w2 = jax.random.uniform(k3, (input_size, output_size), jnp.float32, -bound, bound)
    b2 = jax.random.uniform(k4, (output_size,), jnp.float32, -bound, bound)
    return w1, b1, w2, b2


if __name__ == "__main__":
    key = jax.random.PRNGKey(0)
    k_x, k_p = jax.random.split(key)

    batch = 24
    input_size = 128
    output_size = 64

    x = jax.random.normal(k_x, (batch, input_size), dtype=jnp.float32)
    w1, b1, w2, b2 = init_params(k_p, input_size, output_size)

    # One-time param preparation (lane padding + bf16 cast) outside the jit.
    w1_p, b1_p, w2_p, b2_p, f_out = prepare_params(w1, b1, w2, b2)

    # Small block_b so the demo runs a multi-step pipelined grid (3 steps).
    out = mlp_forward(x, w1_p, b1_p, w2_p, b2_p, out_features=f_out, block_b=8)
    out = jax.block_until_ready(out)

    # Reference in plain JAX with the same bf16-operand / f32-accumulate math
    # (eval-mode dropout == identity).
    h_ref = jnp.maximum(
        jnp.dot(x.astype(jnp.bfloat16), w1.astype(jnp.bfloat16),
                preferred_element_type=jnp.float32) + b1.reshape(1, -1), 0.0)
    ref = jnp.dot(h_ref.astype(jnp.bfloat16), w2.astype(jnp.bfloat16),
                  preferred_element_type=jnp.float32) + b2.reshape(1, -1)

    assert out.shape == (batch, output_size)
    assert jnp.allclose(out, ref, atol=2e-3, rtol=2e-3)

    print("KERNEL_OK")
</pallas_src>

<mosaic_0001>
module attributes {stable_mosaic.version = 11 : i64} {
  func.func @mlp_kernel(%arg0: i32, %arg1: memref<8x128xf32, #tpu.memory_space<vmem>>, %arg2: memref<128x128xbf16, #tpu.memory_space<vmem>>, %arg3: memref<1x128xf32, #tpu.memory_space<vmem>>, %arg4: memref<128x128xbf16, #tpu.memory_space<vmem>>, %arg5: memref<1x128xf32, #tpu.memory_space<vmem>>, %arg6: memref<8x128xf32, #tpu.memory_space<vmem>>) attributes {dimension_semantics = [#tpu.dimension_semantics<parallel>], iteration_bounds = array<i64: 3>, scalar_prefetch = 0 : i64, scratch_operands = 0 : i64, tpu.core_type = #tpu.core_type<tc>, window_params = [{transform_indices = @transform_0, window_bounds = array<i64: 8, 128>}, {pipeline_mode = #tpu.pipeline_mode<synchronous>, transform_indices = @transform_1, window_bounds = array<i64: 128, 128>}, {pipeline_mode = #tpu.pipeline_mode<synchronous>, transform_indices = @transform_2, window_bounds = array<i64: 1, 128>}, {pipeline_mode = #tpu.pipeline_mode<synchronous>, transform_indices = @transform_3, window_bounds = array<i64: 128, 128>}, {pipeline_mode = #tpu.pipeline_mode<synchronous>, transform_indices = @transform_4, window_bounds = array<i64: 1, 128>}, {transform_indices = @transform_5, window_bounds = array<i64: 8, 128>}]} {
    %c0 = arith.constant 0 : index
    %c0_0 = arith.constant 0 : index
    %0 = vector.load %arg1[%c0, %c0_0] : memref<8x128xf32, #tpu.memory_space<vmem>>, vector<8x128xf32>
    %1 = arith.truncf %0 : vector<8x128xf32> to vector<8x128xbf16>
    %c0_1 = arith.constant 0 : index
    %c0_2 = arith.constant 0 : index
    %2 = vector.load %arg2[%c0_1, %c0_2] : memref<128x128xbf16, #tpu.memory_space<vmem>>, vector<128x128xbf16>
    %cst = arith.constant dense<0.000000e+00> : vector<8x128xf32>
    %3 = tpu.matmul %1, %2, %cst {dimension_numbers = #tpu.dot_dimension_numbers<[1], [0], [0], [1], [0, 0, 1, 1], [], []>} : vector<8x128xbf16>, vector<128x128xbf16>, vector<8x128xf32> -> vector<8x128xf32>
    %c0_3 = arith.constant 0 : index
    %c0_4 = arith.constant 0 : index
    %4 = vector.load %arg3[%c0_3, %c0_4] : memref<1x128xf32, #tpu.memory_space<vmem>>, vector<1x128xf32>
    %5 = vector.broadcast %4 : vector<1x128xf32> to vector<8x128xf32>
    %6 = arith.addf %3, %5 : vector<8x128xf32>
    %cst_5 = arith.constant 0.000000e+00 : f32
    %7 = vector.broadcast %cst_5 : f32 to vector<8x128xf32>
    %8 = arith.maximumf %6, %7 : vector<8x128xf32>
    %9 = arith.truncf %8 : vector<8x128xf32> to vector<8x128xbf16>
    %c0_6 = arith.constant 0 : index
    %c0_7 = arith.constant 0 : index
    %10 = vector.load %arg4[%c0_6, %c0_7] : memref<128x128xbf16, #tpu.memory_space<vmem>>, vector<128x128xbf16>
    %cst_8 = arith.constant dense<0.000000e+00> : vector<8x128xf32>
    %11 = tpu.matmul %9, %10, %cst_8 {dimension_numbers = #tpu.dot_dimension_numbers<[1], [0], [0], [1], [0, 0, 1, 1], [], []>} : vector<8x128xbf16>, vector<128x128xbf16>, vector<8x128xf32> -> vector<8x128xf32>
    %c0_9 = arith.constant 0 : index
    %c0_10 = arith.constant 0 : index
    %12 = vector.load %arg5[%c0_9, %c0_10] : memref<1x128xf32, #tpu.memory_space<vmem>>, vector<1x128xf32>
    %13 = vector.broadcast %12 : vector<1x128xf32> to vector<8x128xf32>
    %14 = arith.addf %11, %13 : vector<8x128xf32>
    %c0_11 = arith.constant 0 : index
    %c0_12 = arith.constant 0 : index
    %15 = vector.load %arg6[%c0_11, %c0_12] : memref<8x128xf32, #tpu.memory_space<vmem>>, vector<8x128xf32>
    tpu.vector_store %arg6[%c0_11, %c0_12], %14 {strides = array<i32>} : memref<8x128xf32, #tpu.memory_space<vmem>>, vector<8x128xf32>,
    return
  }
  func.func @transform_0(%arg0: i32) -> (i32, i32) {
    %c0_i32 = arith.constant 0 : i32
    %c0_i32_0 = arith.constant 0 : i32
    return %arg0, %c0_i32 : i32, i32
  }
  func.func @transform_1(%arg0: i32) -> (i32, i32) {
    %c0_i32 = arith.constant 0 : i32
    %c0_i32_0 = arith.constant 0 : i32
    %c0_i32_1 = arith.constant 0 : i32
    return %c0_i32, %c0_i32_0 : i32, i32
  }
  func.func @transform_2(%arg0: i32) -> (i32, i32) {
    %c0_i32 = arith.constant 0 : i32
    %c0_i32_0 = arith.constant 0 : i32
    %c0_i32_1 = arith.constant 0 : i32
    return %c0_i32, %c0_i32_0 : i32, i32
  }
  func.func @transform_3(%arg0: i32) -> (i32, i32) {
    %c0_i32 = arith.constant 0 : i32
    %c0_i32_0 = arith.constant 0 : i32
    %c0_i32_1 = arith.constant 0 : i32
    return %c0_i32, %c0_i32_0 : i32, i32
  }
  func.func @transform_4(%arg0: i32) -> (i32, i32) {
    %c0_i32 = arith.constant 0 : i32
    %c0_i32_0 = arith.constant 0 : i32
    %c0_i32_1 = arith.constant 0 : i32
    return %c0_i32, %c0_i32_0 : i32, i32
  }
  func.func @transform_5(%arg0: i32) -> (i32, i32) {
    %c0_i32 = arith.constant 0 : i32
    %c0_i32_0 = arith.constant 0 : i32
    return %arg0, %c0_i32 : i32, i32
  }
}

</mosaic_0001>

<bundles_post_ra>
// kernel: mlp_forward.1
= control target key start
LH: loop header
LB: loop body
LE: loop exit
PB: predicated region body
PF: predicated region fallthrough
CT: control target
= control target key end

     0   :  { %10 = vsyncpa [#allocation3], 0  ;;  %s1066_s0 = inlined_call_operand.hbm [shape: f32[24,128], index: 0, kind: input, shape index: {}]   ;;  %s1067_s1 = inlined_call_operand.hbm [shape: bf16[128,128], index: 1, kind: input, shape index: {}]   ;;  %s1068_s2 = inlined_call_operand.vmem [shape: f32[1,128], index: 2, kind: input, shape index: {}]   ;;  %s1069_s3 = inlined_call_operand.hbm [shape: bf16[128,128], index: 3, kind: input, shape index: {}]   ;;  %s1070_s4 = inlined_call_operand.vmem [shape: f32[1,128], index: 4, kind: input, shape index: {}]   ;;  %s1071_s5 = inlined_call_operand.hbm [shape: f32[24,128], index: 5, kind: output, shape index: {}]  }
   0x1   :  { %12 = vsyncpa [#allocation3 + $0x1], 0 }
   0x2   :  { %13 = vsyncpa [#allocation6], 0 }
   0x3   :  { %14 = vsyncpa [#allocation4], 0 }
   0x4   :  { %16 = vsyncpa [#allocation4 + $0x1], 0  ;;  %s910_s18 = smov 0   ;;  %s912_s19 = smov 0  }
   0x5   :  { %s914_s20 = smov 0   ;;  %s916_s21 = smov 0  }
   0x6 LB: > { %s174_s24 = sshll.u32 %s1067_s1, 4  ;;  %s934_s25 = sadd.s32 4294967295, %s874_s21   ;;  %s874_s21 = sphi %s916_s21, %s1081_s21   ;;  %s870_s20 = sphi %s914_s20, %s1080_s20   ;;  %s866_s19 = sphi %s912_s19, %s1079_s19   ;;  %s862_s18 = sphi %s910_s18, %s1078_s18   ;;  %s175_s24 = int_to_ptr.hbm [resolvable:$true] %s174_s24 }
   0x7   : > { %p548_p0 = scmp.ge.s32.totalorder %s874_s21, 1  ;;  %p43_p1 = scmp.eq.s32.totalorder %s934_s25, 0 }
   0x8   : > { %p163_p2 = scmp.lt.s32.totalorder %s874_s21, 4  ;;  %s876_s27 = smov [#allocation5]  }
   0x9   : > { %s176_s28 = sshll.u32 %s876_s27, 4  ;;  %s191_s6 = sshll.u32 %s1069_s3, 4  ;;  %s177_s28 = int_to_ptr.vmem [resolvable:$true] %s176_s28  ;;  %s192_s6 = int_to_ptr.hbm [resolvable:$true] %s191_s6 }
   0xa   : > { %p939_p3 = pnand %p548_p0, %p163_p2  ;;  %s877_s7 = smov [#allocation7]  }
   0xb   : > { %s193_s8 = sshll.u32 %s877_s7, 4  ;;  %s878_s9 = smov 64   ;;  %s194_s8 = int_to_ptr.vmem [resolvable:$true] %s193_s8 }
   0xc   : > { %p655_p4 = pneg %p939_p3  ;;  %s879_s10 = smov 4  }
   0xd   : > { %s547_s11 = sadd.s32 4294967294, %s874_s21   ;;  %s952_s12 = sadd.s32 1, %s874_s21  }
   0xe   : > { %p656_p5 = pnand %p655_p4, %p43_p1  ;;  %s26_s13 = ssub.s32 %s874_s21, %s952_s12 }
   0xf   : > { %s29_s14 = sadd.s32 1, %s870_s20  ;;  %p27_p6 = scmp.eq.s32.totalorder %s26_s13, 0 }
  0x10   : > { %658 = dma.hbm_to_vmem [thread:$0]  (!%p656_p5), %s175_s24, 1024, %s177_s28, [#allocation6], %s878_s9, %s878_s9, %s879_s10  }
  0x11   : > { %661 = dma.hbm_to_vmem [thread:$0]  (!%p656_p5), %s192_s6, 1024, %s194_s8, [#allocation6], %s878_s9, %s878_s9, %s879_s10  }
  0x12   : > { %p36_p7 = scmp.ne.s32.totalorder %s870_s20, %s866_s19  ;;  %p37_p8 = scmp.eq.s32.totalorder %s874_s21, 0 }
  0x13   : > { %p42_p9 = scmp.ne.s32.totalorder %s866_s19, %s862_s18  ;;  %p150_p12 = scmp.eq.s32.totalorder %s934_s25, 2 }
  0x14   : > { %s963_s15 = scalar_select %p27_p6, %s870_s20, %s29_s14  }
  0x15   : > { %p965_p10 = por %p37_p8, %p36_p7  ;;  %p971_p11 = por %p43_p1, %p42_p9 }
  0x16   : > { %p156_p13 = scmp.eq.s32.totalorder %s547_s11, 2  ;;  %p672_p0 = scmp.lt.s32.totalorder %s874_s21, 3 }
  0x17   : > { %s210_s22 = sand.u32 1, %s870_s20   ;;  %p978_p2 = por %p150_p12, %p36_p7 }
  0x18   : > { %p982_p4 = por %p156_p13, %p42_p9  ;;  %s552_s27 = sshll.u32 %s210_s22, 3 }
  0x19   : > { %s553_s28 = sshll.u32 %s874_s21, 3  ;;  %s214_s7 = scalar_lea.vmem [#allocation2], %s552_s27 }
  0x1a   : > { %s218_s6 = scalar_lea.hbm %s1066_s0, %s553_s28  ;;  %s222_s8 = sshll.u32 %s214_s7, 4  ;;  %s223_s8 = int_to_ptr.vmem [resolvable:$true] %s222_s8 }
  0x1b   : > { %s220_s9 = sshll.u32 %s218_s6, 4  ;;  %p992_p5 = pnand %p672_p0, %p965_p10  ;;  %s221_s9 = int_to_ptr.hbm [resolvable:$true] %s220_s9 }
  0x1c   : > { %s211_s11 = scalar_lea.sflag [#allocation3], %s210_s22  ;;  %s774_s13 = sshra.s32 %s221_s9, 4  ;;  %s775_s13 = int_to_ptr.hbm [resolvable:$true] %s774_s13 }
  0x1d   : > { %s776_s14 = scalar_lea.hbm %s775_s13, 8  ;;  %p778_p7 = pneg %p992_p5 }
  0x1e   : > { %p777_p6 = scmp.ne.s32.totalorder %s775_s13, %s776_s14  ;;  %s781_s29 = scalar_lea.hbm %s1066_s0, 24 }
  0x1f   : > { %p782_p10 = scmp.lt.s32.totalorder %s775_s13, %s1066_s0  ;;  %p783_p12 = scmp.lt.s32.totalorder %s781_s29, %s776_s14 }
  0x20   : > { %p779_p8 = pnand %p778_p7, %p777_p6 }
  0x21   : > { %p784_p13 = por %p783_p12, %p782_p10 }
  0x22   : > { %p780_p9 = pneg %p779_p8 }
  0x24   : > { %p785_p0 = pnand %p784_p13, %p780_p9 }
  0x26   : > { %788 = shalt.err (!%p785_p0)
}
  0x27   : > { %665 = dma.hbm_to_vmem [thread:$0]  (!%p992_p5), %s221_s9, 128, %s223_s8, %s211_s11  }
  0x28   : > { %231 = sbr.rel (%p939_p3) target bundleno = 346 (0x15a), region = 40  ;;  %s1009_s22 = sand.u32 (!%p939_p3), 1, %s866_s19  }
  0x29   : > { %s555_s6 = sshll.u32 (!%p939_p3), %s1009_s22, 3  ;;  %s234_s7 = scalar_lea.sflag (!%p939_p3), [#allocation3], %s1009_s22 }
  0x2a   : > { %s1015_s13 = scalar_lea.vmem (!%p939_p3), [#allocation2], %s555_s6 }
  0x2d   : > { %849 = dma.done.wait (%p971_p11), %s234_s7, 128  }
  0x2e   : > { %851 = vsyncadd (%p971_p11), %s234_s7, 4294967168 }
  0x2f   : > { %853 = dma.done.wait (%p43_p1), [#allocation6], 2048  }
  0x30   : > { %855 = vsyncadd (%p43_p1), [#allocation6], 4294965248  ;;  %v634_v0 = vld [vmem:[#allocation5 + $0x38] sm:$0xff]  ;;  %v633_v1 = vld [vmem:[#allocation5 + $0x30] sm:$0xff]  ;;  %s624_s8 = sshll.u32 %s934_s25, 3  ;;  %s274_s28 = scalar_lea.vmem [#allocation8], %s555_s6 }
  0x31   : > { %345 = vmatpush.bf16.msra.mxu0 %v634_v0  ;;  %v642_v2 = vld [vmem:[#allocation7 + $0x38] sm:$0xff]  ;;  %v641_v3 = vld [vmem:[#allocation7 + $0x30] sm:$0xff]  ;;  %v632_v4 = vld [vmem:[#allocation5 + $0x28] sm:$0xff]  ;;  %s453_s11 = scalar_lea.hbm %s1071_s5, %s624_s8  ;;  %s455_s29 = sshll.u32 %s274_s28, 4  ;;  %s456_s29 = int_to_ptr.vmem [resolvable:$true] %s455_s29 }
  0x32   : > { %428 = vmatpush.bf16.msra.mxu1 %v642_v2  ;;  %v640_v5 = vld [vmem:[#allocation7 + $0x28] sm:$0xff]  ;;  %v631_v6 = vld [vmem:[#allocation5 + $0x20] sm:$0xff]  ;;  %v630_v8 = vld [vmem:[#allocation5 + $0x18] sm:$0xff]  ;;  %s457_s30 = sshll.u32 %s453_s11, 4  ;;  %s443_s16 = scalar_lea.sflag [#allocation4], %s1009_s22  ;;  %s458_s30 = int_to_ptr.hbm [resolvable:$true] %s457_s30 }
  0x33   : > { %v639_v7 = vld [vmem:[#allocation7 + $0x20] sm:$0xff]  ;;  %v638_v9 = vld [vmem:[#allocation7 + $0x18] sm:$0xff]  ;;  %v629_v10 = vld [vmem:[#allocation5 + $0x10] sm:$0xff]  ;;  %s818_s25 = sshra.s32 %s458_s30, 4  ;;  %s824_s17 = scalar_lea.hbm %s1071_s5, 24  ;;  %s819_s25 = int_to_ptr.hbm [resolvable:$true] %s818_s25 }
  0x34   : > { %v637_v11 = vld [vmem:[#allocation7 + $0x10] sm:$0xff]  ;;  %v628_v12 = vld [vmem:[#allocation5 + $0x8] sm:$0xff]  ;;  %v627_v13 = vld [vmem:[#allocation5] sm:$0xff]  ;;  %s820_s7 = scalar_lea.hbm %s819_s25, 8  ;;  %p825_p5 = scmp.lt.s32.totalorder %s819_s25, %s1071_s5 }
  0x35   : > { %346 = vmatpush.bf16.msra.mxu0 %v633_v1  ;;  %v275_v14 = vld [vmem:[%s1015_s13] sm:$0xff]  ;;  %v636_v16 = vld [vmem:[#allocation7 + $0x8] sm:$0xff]  ;;  %v635_v17 = vld [vmem:[#allocation7] sm:$0xff]  ;;  %p821_p1 = scmp.ne.s32.totalorder %s819_s25, %s820_s7  ;;  %p826_p6 = scmp.lt.s32.totalorder %s824_s17, %s820_s7 }
  0x36   : > { %429 = vmatpush.bf16.msra.mxu1 %v641_v3  ;;  %v276_v15 = vpack.c.bf16 %v275_v14, %v275_v14  ;;  %v712_v18 = vld [vmem:[%s1068_s2] ss:$0 sm:$0xff] }
  0x37   : > { %v713_v24 = vld [vmem:[%s1070_s4] ss:$0 sm:$0xff]  ;;  %p822_p3 = pnand %p821_p1, %p978_p2  ;;  %p827_p7 = por %p826_p6, %p825_p5 }
  0x39   : > { %347 = vmatpush.bf16.msra.mxu0 %v632_v4  ;;  %p823_p11 = pneg %p822_p3 }
  0x3a   : > { %430 = vmatpush.bf16.msra.mxu1 %v640_v5 }
  0x3b   : > { %p828_p8 = pnand %p827_p7, %p823_p11 }
  0x3d   : > { %348 = vmatpush.bf16.msra.mxu0 %v631_v6 }
  0x3e   : > { %431 = vmatpush.bf16.msra.mxu1 %v639_v7 }
  0x41   : > { %349 = vmatpush.bf16.msra.mxu0 %v630_v8 }
  0x42   : > { %432 = vmatpush.bf16.msra.mxu1 %v638_v9 }
  0x45   : > { %350 = vmatpush.bf16.msra.mxu0 %v629_v10 }
  0x46   : > { %433 = vmatpush.bf16.msra.mxu1 %v637_v11 }
  0x49   : > { %351 = vmatpush.bf16.msra.mxu0 %v628_v12 }
  0x4a   : > { %434 = vmatpush.bf16.msra.mxu1 %v636_v16 }
  0x4d   : > { %352 = vmatpush.bf16.msra.mxu0 %v627_v13 }
  0x4e   : > { %435 = vmatpush.bf16.msra.mxu1 %v635_v17 }
  0x50   : > { %353 = vmatmul.bf16.vlgmr.msra.gmra.mxu0 %v276_v15 }
  0xcd   : > { %v354_v19 = vpop.f32.mrf.mxu0 }
  0xce   : > { %v355_v20 = vadd.f32 %v712_v18, %v354_v19 }
  0xd0   : > { %v358_v21 = vmax.f32 %v355_v20, 0.0 }
  0xd2   : > { %v359_v22 = vpack.c.bf16 %v358_v21, %v358_v21 }
  0xd4   : > { %436 = vmatmul.bf16.vlgmr.msra.gmra.mxu1 %v359_v22 }
  0xd5   : > { %v356_v23 = vpop.f32.mrf.mxu0 }
 0x151   : > { %v437_v25 = vpop.f32.mrf.mxu1 }
 0x152   : > { %v438_v26 = vadd.f32 %v713_v24, %v437_v25 }
 0x154   : > { %441 = vst [vmem:[%s274_s28] sm:$0xff] %v438_v26 }
 0x155   : > { %831 = shalt.err (!%p828_p8)
}
 0x156   : > { %653 = dma.vmem_to_hbm [thread:$0]  (%p978_p2), %s456_s29, 128, %s458_s30, %s443_s16  }
 0x159   : > { %v439_v27 = vpop.f32.mrf.mxu1 }
 0x15a PF: > { %p675_p9 = scmp.ge.s32.totalorder %s874_s21, 2  ;;  %s469_s22 = sand.u32 1, %s862_s18  }
 0x15b   : > { %s470_s9 = scalar_lea.sflag [#allocation4], %s469_s22 }
 0x15c   : > { %p667_p10 = pnand %p675_p9, %p982_p4 }
 0x15e   : > { %p668_p12 = pneg %p667_p10 }
 0x160   : > { %857 = dma.done.wait (%p668_p12), %s470_s9, 128  }
 0x161   : > { %859 = vsyncadd (%p668_p12), %s470_s9, 4294967168  ;;  %p19_p13 = scmp.ge.s32.totalorder %s952_s12, 5   ;;  %s1078_s18 = smov %s866_s19 }
 0x162   : > { %s1079_s19 = smov %s870_s20  ;;  %s1080_s20 = smov %s963_s15 }
 0x163   : > { %s1081_s21 = smov %s952_s12  ;;  %21 = sbr.rel (!%p19_p13) target bundleno = 6 (0x6), region = 93 }
 0x168   :  { %476 = vsyncpa [#allocation3], 1 }
 0x169   :  { %478 = vsyncpa [#allocation3 + $0x1], 1 }
 0x16a   :  { %479 = vsyncpa [#allocation6], 1 }
 0x16b   :  { %480 = vsyncpa [#allocation4], 1 }
 0x16c   :  { %482 = vsyncpa [#allocation4 + $0x1], 1 }

</bundles_post_ra>
